<compile_context>
chip_gen: v6e
topology: v6e:2x2x1
jax: 0.10.0
libtpu: 0.0.40
codegen_flags: <defaults>
</compile_context>

<pallas_src>
import jax
import jax.numpy as jnp
from jax.experimental import pallas as pl
from jax.experimental.pallas import tpu as pltpu


def _round_up(n, m):
    return ((n + m - 1) // m) * m


def cnn_kernel(x_ref, cw_ref, fw_ref, bias_ref, out_ref):
    """x_ref:   (bn, 4*C)      bf16  -- timesteps 0..3 flattened time-major.
       cw_ref:  (4*C, 3*POS)   bf16  -- banded conv weight; conv position p
                                        occupies lanes [p*POS, p*POS+O).
       fw_ref:  (POS, OUT_P)   bf16  -- fc weight transposed + zero padded.
       bias_ref:(1, OUT_P)     f32   -- fused bias = conv_b @ fc_w.T + fc_b
                                        (padded columns hold -1e30).
       out_ref: (bn, OUT)      f32   -- softmax probabilities (unpadded)."""
    pos = fw_ref.shape[0]
    out = out_ref.shape[-1]

    # Conv for the single pool window: one MXU push, (bn, 4C) @ (4C, 3*POS).
    s = jnp.dot(x_ref[...], cw_ref[...], preferred_element_type=jnp.float32)

    # MaxPool1d over the three positions: 128-lane-aligned slices -> no lane
    # shuffle, pure VPU max.  (Conv bias was hoisted into bias_ref.)
    pooled = jnp.maximum(jnp.maximum(s[:, 0:pos], s[:, pos:2 * pos]),
                         s[:, 2 * pos:3 * pos])

    # fc: bf16 MXU operands, f32 accumulate, fused bias added once.
    logits = jnp.dot(pooled.astype(jnp.bfloat16), fw_ref[...],
                     preferred_element_type=jnp.float32) + bias_ref[...]

    # Softmax over the last axis (== torch dim=1); f32 epilogue (v5e-safe).
    # Padded columns carry a -1e30 bias -> exactly 0 probability.
    m = jnp.max(logits, axis=-1, keepdims=True)
    e = jnp.exp(logits - m)
    denom = jnp.sum(e, axis=-1, keepdims=True)
    probs = e * pl.reciprocal(denom, approx=False)   # exact: EUP idle, free

    # Store only the real OUT columns -> no 16x HBM write amplification.
    out_ref[...] = probs[:, :out]


def cnn_forward(x, conv_w, conv_b, fc_w, fc_b, *, batch_block=2048):
    """x: (N, C, L) NCW; conv_w: (O, C, 3); conv_b: (O,); fc_w: (OUT, C); fc_b: (OUT,)."""
    N, C, L = x.shape
    O = conv_w.shape[0]
    OUT = fc_w.shape[0]
    assert conv_w.shape[2] == 3
    assert O == fc_w.shape[1], "module requires out_channels == in_channels (fc in_features)"
    assert L >= 3, "MaxPool1d(kernel_size=3) needs seq_len >= 3"

    LANE = 128
    POS = _round_up(O, LANE)           # per-position lane stride in the banded weight
    OUT_P = _round_up(OUT, LANE)       # fc compute width (MXU-friendly); HBM out is OUT

    # --- input prep: only the 4 timesteps the single pool window reads -------
    xs = x[:, :, :4]
    if L == 3:                         # right zero-pad so tap t=3 always exists
        xs = jnp.pad(xs, ((0, 0), (0, 0), (0, 1)))
    # Time-major flatten: column t*C + c == x[n, c, t]; bf16 halves HBM bytes.
    x_flat = jnp.transpose(xs, (0, 2, 1)).reshape(N, 4 * C).astype(jnp.bfloat16)

    # --- batch tiling: bn multiple of 8, batch padded to a multiple of bn ----
    bb = max(8, _round_up(batch_block, 8))
    bn = min(bb, _round_up(N, 8))
    N_pad = _round_up(N, bn)
    if N_pad != N:
        x_flat = jnp.pad(x_flat, ((0, N_pad - N), (0, 0)))  # zero rows, sliced off later

    # --- banded conv weight (conv+pool window fused into one matmul) ---------
    # wb[t*C + c, p*POS + o] = conv_w[o, c, t - p + 1]   if 0 <= t-p+1 <= 2 else 0
    wt = jnp.transpose(conv_w, (2, 1, 0)).astype(jnp.float32)   # (3, C, O): [k, c, o]
    zero_blk = jnp.zeros((C, POS), jnp.float32)
    rows = []
    for t in range(4):
        row = []
        for p in range(3):
            k = t - p + 1
            if 0 <= k <= 2:
                row.append(jnp.pad(wt[k], ((0, 0), (0, POS - O))))
            else:
                row.append(zero_blk)
        rows.append(jnp.concatenate(row, axis=1))               # (C, 3*POS)
    wb = jnp.concatenate(rows, axis=0).astype(jnp.bfloat16)     # (4*C, 3*POS)

    # --- fc weight + fused bias ----------------------------------------------
    fw_f32 = jnp.transpose(fc_w).astype(jnp.float32)            # (C, OUT)
    fused_bias = conv_b.astype(jnp.float32) @ fw_f32 + fc_b.astype(jnp.float32)
    fw_p = (jnp.zeros((POS, OUT_P), jnp.float32)
            .at[:C, :OUT].set(fw_f32).astype(jnp.bfloat16))     # (POS, OUT_P)
    bias_p = (jnp.full((1, OUT_P), -1e30, jnp.float32)          # -1e30 must stay f32
              .at[0, :OUT].set(fused_bias))

    # --- batch grid: double-buffered DMA + megacore ("parallel") -------------
    grid = (N_pad // bn,)

    out = pl.pallas_call(
        cnn_kernel,
        out_shape=jax.ShapeDtypeStruct((N_pad, OUT), jnp.float32),
        grid=grid,
        in_specs=[
            pl.BlockSpec((bn, 4 * C), lambda i: (i, 0)),        # x tile (contiguous DMA)
            pl.BlockSpec((4 * C, 3 * POS), lambda i: (0, 0)),   # banded conv weight (resident)
            pl.BlockSpec((POS, OUT_P), lambda i: (0, 0)),       # fc weight (resident)
            pl.BlockSpec((1, OUT_P), lambda i: (0, 0)),         # fused bias (resident)
        ],
        out_specs=pl.BlockSpec((bn, OUT), lambda i: (i, 0)),    # unpadded writeback
        compiler_params=pltpu.CompilerParams(
            dimension_semantics=("parallel",)),
    )(x_flat, wb, fw_p, bias_p)

    return out[:N]


def reference(x, conv_w, conv_b, fc_w, fc_b):
    """Pure-JAX f32 reference mirroring the PyTorch forward exactly."""
    L = x.shape[-1]
    xp = jnp.pad(x, ((0, 0), (0, 0), (1, 1)))                          # zero padding=1
    cols = jnp.stack([xp[:, :, l:l + 3] for l in range(L)], axis=-1)   # (N, C, 3, L)
    y = jnp.einsum("nckl,ock->nol", cols, conv_w) + conv_b[None, :, None]
    pooled = jnp.max(y[:, :, :3], axis=-1)                             # single pool window
    logits = pooled @ fc_w.T + fc_b
    return jax.nn.softmax(logits, axis=1)


if __name__ == "__main__":
    # Small shapes consistent with the module (out_channels == in_channels is
    # required by the torch module's fc layer).
    N = 2
    in_channels = 4
    out_channels = 4
    seq_len = 8
    output_size = 8

    key = jax.random.PRNGKey(0)
    kx, kcw, kcb, kfw, kfb = jax.random.split(key, 5)

    x = jax.random.normal(kx, (N, in_channels, seq_len), dtype=jnp.float32)

    cbound = 1.0 / (in_channels * 3) ** 0.5
    conv_w = jax.random.uniform(kcw, (out_channels, in_channels, 3),
                                minval=-cbound, maxval=cbound, dtype=jnp.float32)
    conv_b = jax.random.uniform(kcb, (out_channels,),
                                minval=-cbound, maxval=cbound, dtype=jnp.float32)
    fbound = 1.0 / in_channels ** 0.5
    fc_w = jax.random.uniform(kfw, (output_size, in_channels),
                              minval=-fbound, maxval=fbound, dtype=jnp.float32)
    fc_b = jax.random.uniform(kfb, (output_size,),
                              minval=-fbound, maxval=fbound, dtype=jnp.float32)

    out = jax.block_until_ready(cnn_forward(x, conv_w, conv_b, fc_w, fc_b))
    ref = jax.block_until_ready(reference(x, conv_w, conv_b, fc_w, fc_b))

    assert out.shape == (N, output_size)
    # bf16 MXU operands -> compare with a mixed-precision tolerance
    # (probabilities in [0, 1]); the reciprocal is exact so rows sum to 1.
    assert jnp.allclose(out, ref, atol=2e-2), float(jnp.max(jnp.abs(out - ref)))
    assert jnp.allclose(jnp.sum(out, axis=1), 1.0, atol=1e-3)

    print("KERNEL_OK")
</pallas_src>

<mosaic_0001>
module attributes {stable_mosaic.version = 11 : i64} {
  func.func @cnn_kernel(%arg0: i32, %arg1: memref<8x16xbf16, #tpu.memory_space<vmem>>, %arg2: memref<16x384xbf16, #tpu.memory_space<vmem>>, %arg3: memref<128x128xbf16, #tpu.memory_space<vmem>>, %arg4: memref<1x128xf32, #tpu.memory_space<vmem>>, %arg5: memref<8x8xf32, #tpu.memory_space<vmem>>) attributes {dimension_semantics = [#tpu.dimension_semantics<parallel>], iteration_bounds = array<i64: 1>, scalar_prefetch = 0 : i64, scratch_operands = 0 : i64, tpu.core_type = #tpu.core_type<tc>, window_params = [{transform_indices = @transform_0, window_bounds = array<i64: 8, 16>}, {pipeline_mode = #tpu.pipeline_mode<synchronous>, transform_indices = @transform_1, window_bounds = array<i64: 16, 384>}, {pipeline_mode = #tpu.pipeline_mode<synchronous>, transform_indices = @transform_2, window_bounds = array<i64: 128, 128>}, {pipeline_mode = #tpu.pipeline_mode<synchronous>, transform_indices = @transform_3, window_bounds = array<i64: 1, 128>}, {transform_indices = @transform_4, window_bounds = array<i64: 8, 8>}]} {
    %c0 = arith.constant 0 : index
    %c0_0 = arith.constant 0 : index
    %0 = vector.load %arg1[%c0, %c0_0] : memref<8x16xbf16, #tpu.memory_space<vmem>>, vector<8x16xbf16>
    %c0_1 = arith.constant 0 : index
    %c0_2 = arith.constant 0 : index
    %1 = vector.load %arg2[%c0_1, %c0_2] : memref<16x384xbf16, #tpu.memory_space<vmem>>, vector<16x384xbf16>
    %cst = arith.constant dense<0.000000e+00> : vector<8x384xf32>
    %2 = tpu.matmul %0, %1, %cst {dimension_numbers = #tpu.dot_dimension_numbers<[1], [0], [0], [1], [0, 0, 1, 1], [], []>} : vector<8x16xbf16>, vector<16x384xbf16>, vector<8x384xf32> -> vector<8x384xf32>
    %3 = vector.extract_strided_slice %2 {offsets = [0, 0], sizes = [8, 128], strides = [1, 1]} : vector<8x384xf32> to vector<8x128xf32>
    %4 = vector.extract_strided_slice %2 {offsets = [0, 128], sizes = [8, 128], strides = [1, 1]} : vector<8x384xf32> to vector<8x128xf32>
    %5 = arith.maximumf %3, %4 : vector<8x128xf32>
    %6 = vector.extract_strided_slice %2 {offsets = [0, 256], sizes = [8, 128], strides = [1, 1]} : vector<8x384xf32> to vector<8x128xf32>
    %7 = arith.maximumf %5, %6 : vector<8x128xf32>
    %8 = arith.truncf %7 : vector<8x128xf32> to vector<8x128xbf16>
    %c0_3 = arith.constant 0 : index
    %c0_4 = arith.constant 0 : index
    %9 = vector.load %arg3[%c0_3, %c0_4] : memref<128x128xbf16, #tpu.memory_space<vmem>>, vector<128x128xbf16>
    %cst_5 = arith.constant dense<0.000000e+00> : vector<8x128xf32>
    %10 = tpu.matmul %8, %9, %cst_5 {dimension_numbers = #tpu.dot_dimension_numbers<[1], [0], [0], [1], [0, 0, 1, 1], [], []>} : vector<8x128xbf16>, vector<128x128xbf16>, vector<8x128xf32> -> vector<8x128xf32>
    %c0_6 = arith.constant 0 : index
    %c0_7 = arith.constant 0 : index
    %11 = vector.load %arg4[%c0_6, %c0_7] : memref<1x128xf32, #tpu.memory_space<vmem>>, vector<1x128xf32>
    %12 = vector.broadcast %11 : vector<1x128xf32> to vector<8x128xf32>
    %13 = arith.addf %10, %12 : vector<8x128xf32>
    %cst_8 = arith.constant dense<0xFF800000> : vector<8xf32>
    %14 = vector.multi_reduction <maximumf>, %13, %cst_8 [1] : vector<8x128xf32> to vector<8xf32>
    %15 = vector.shape_cast %14 : vector<8xf32> to vector<8x1xf32>
    %16 = vector.broadcast %15 : vector<8x1xf32> to vector<8x128xf32>
    %17 = arith.subf %13, %16 : vector<8x128xf32>
    %18 = math.exp %17 : vector<8x128xf32>
    %cst_9 = arith.constant dense<0.000000e+00> : vector<8xf32>
    %19 = vector.multi_reduction <add>, %18, %cst_9 [1] : vector<8x128xf32> to vector<8xf32>
    %20 = vector.shape_cast %19 : vector<8xf32> to vector<8x1xf32>
    %21 = tpu.reciprocal %20 : vector<8x1xf32> -> vector<8x1xf32>
    %22 = vector.broadcast %21 : vector<8x1xf32> to vector<8x128xf32>
    %23 = arith.mulf %18, %22 : vector<8x128xf32>
    %24 = vector.extract_strided_slice %23 {offsets = [0, 0], sizes = [8, 8], strides = [1, 1]} : vector<8x128xf32> to vector<8x8xf32>
    %c0_10 = arith.constant 0 : index
    %c0_11 = arith.constant 0 : index
    %25 = vector.load %arg5[%c0_10, %c0_11] : memref<8x8xf32, #tpu.memory_space<vmem>>, vector<8x8xf32>
    tpu.vector_store %arg5[%c0_10, %c0_11], %24 {strides = array<i32>} : memref<8x8xf32, #tpu.memory_space<vmem>>, vector<8x8xf32>,
    return
  }
  func.func @transform_0(%arg0: i32) -> (i32, i32) {
    %c0_i32 = arith.constant 0 : i32
    %c0_i32_0 = arith.constant 0 : i32
    return %arg0, %c0_i32 : i32, i32
  }
  func.func @transform_1(%arg0: i32) -> (i32, i32) {
    %c0_i32 = arith.constant 0 : i32
    %c0_i32_0 = arith.constant 0 : i32
    %c0_i32_1 = arith.constant 0 : i32
    return %c0_i32, %c0_i32_0 : i32, i32
  }
  func.func @transform_2(%arg0: i32) -> (i32, i32) {
    %c0_i32 = arith.constant 0 : i32
    %c0_i32_0 = arith.constant 0 : i32
    %c0_i32_1 = arith.constant 0 : i32
    return %c0_i32, %c0_i32_0 : i32, i32
  }
  func.func @transform_3(%arg0: i32) -> (i32, i32) {
    %c0_i32 = arith.constant 0 : i32
    %c0_i32_0 = arith.constant 0 : i32
    %c0_i32_1 = arith.constant 0 : i32
    return %c0_i32, %c0_i32_0 : i32, i32
  }
  func.func @transform_4(%arg0: i32) -> (i32, i32) {
    %c0_i32 = arith.constant 0 : i32
    %c0_i32_0 = arith.constant 0 : i32
    return %arg0, %c0_i32 : i32, i32
  }
}

</mosaic_0001>

<bundles_post_ra>
// kernel: tpu_custom_call.1
= control target key start
LH: loop header
LB: loop body
LE: loop exit
PB: predicated region body
PF: predicated region fallthrough
CT: control target
= control target key end

     0   :  { %9 = vsyncpa [#allocation3], 0  ;;  %s522_s0 = inlined_call_operand.hbm [shape: bf16[8,16], index: 0, kind: input, shape index: {}]   ;;  %s523_s1 = inlined_call_operand.hbm [shape: bf16[16,384], index: 1, kind: input, shape index: {}]   ;;  %s524_s2 = inlined_call_operand.hbm [shape: bf16[128,128], index: 2, kind: input, shape index: {}]   ;;  %s525_s3 = inlined_call_operand.vmem [shape: f32[1,128], index: 3, kind: input, shape index: {}]   ;;  %s526_s4 = inlined_call_operand.hbm [shape: f32[8,8], index: 4, kind: output, shape index: {}]  }
   0x1   :  { %10 = vsyncpa [#allocation6], 0 }
   0x2   :  { %11 = vsyncpa [#allocation4], 0  ;;  %s469_s15 = smov [#allocation5]  }
   0x3   :  { %s27_s16 = sshll.u32 %s469_s15, 4  ;;  %s28_s16 = int_to_ptr.vmem [resolvable:$true] %s27_s16 }
   0x4   :  { %s391_s17 = scalar_lea.vmem %s28_s16, 384  ;;  %p396_p1 = scmp.lt.s32.totalorder %s28_s16, %s28_s16 }
   0x5   :  { %p392_p0 = scmp.ne.s32.totalorder %s28_s16, %s391_s17  ;;  %p397_p2 = scmp.lt.s32.totalorder %s391_s17, %s391_s17 }
   0x7   :  { %p398_p3 = por %p397_p2, %p396_p1 }
   0x9   :  { %p399_p4 = pnand %p398_p3, %p392_p0 }
   0xb   :  { %402 = shalt.err (!%p399_p4)
}
   0xc   :  { %s470_s18 = smov 192   ;;  %s471_s19 = smov 12  }
   0xd   :  { %33 = dma.hbm_to_vmem [thread:$0]  %s523_s1, 384, %s28_s16, [#allocation6], %s470_s18, %s470_s18, %s471_s19  }
   0xe   :  { %s472_s22 = smov [#allocation2]   ;;  %s473_s24 = smov [#allocation7]  }
   0xf   :  { %s18_s23 = sshll.u32 %s472_s22, 4  ;;  %s39_s25 = sshll.u32 %s473_s24, 4  ;;  %s19_s23 = int_to_ptr.vmem [resolvable:$true] %s18_s23  ;;  %s40_s25 = int_to_ptr.vmem [resolvable:$true] %s39_s25 }
  0x10   :  { %s411_s26 = scalar_lea.vmem %s19_s23, 64  ;;  %p416_p6 = scmp.lt.s32.totalorder %s19_s23, %s19_s23 }
  0x11   :  { %p412_p5 = scmp.ne.s32.totalorder %s19_s23, %s411_s26  ;;  %p417_p7 = scmp.lt.s32.totalorder %s411_s26, %s411_s26 }
  0x13   :  { %p418_p8 = por %p417_p7, %p416_p6 }
  0x15   :  { %p419_p9 = pnand %p418_p8, %p412_p5 }
  0x17   :  { %422 = shalt.err (!%p419_p9)
}
  0x18   :  { %21 = dma.hbm_to_vmem [thread:$0]  %s522_s0, 64, %s19_s23, [#allocation3]  }
  0x19   :  { %s431_s29 = scalar_lea.vmem %s40_s25, 1024  ;;  %p436_p11 = scmp.lt.s32.totalorder %s40_s25, %s40_s25 }
  0x1a   :  { %p432_p10 = scmp.ne.s32.totalorder %s40_s25, %s431_s29  ;;  %p437_p12 = scmp.lt.s32.totalorder %s431_s29, %s431_s29 }
  0x1c   :  { %p438_p13 = por %p437_p12, %p436_p11 }
  0x1e   :  { %p439_p0 = pnand %p438_p13, %p432_p10 }
  0x20   :  { %442 = shalt.err (!%p439_p0)
}
  0x21   :  { %s474_s1 = smov 64   ;;  %s475_s30 = smov 4  }
  0x22   :  { %45 = dma.hbm_to_vmem [thread:$0]  %s524_s2, 1024, %s40_s25, [#allocation6], %s474_s1, %s474_s1, %s475_s30  }
  0x23   :  { %463 = dma.done.wait [#allocation3], 64  }
  0x24   :  { %464 = vsyncadd [#allocation3], 4294967232 }
  0x25   :  { %465 = dma.done.wait [#allocation6], 1408  }
  0x26   :  { %466 = vsyncadd [#allocation6], 4294965888  ;;  %v476_v0 = vmov 0   ;;  %v477_v1 = vmov 0.0   ;;  %vm478_vm0 = vmmov 0   ;;  %vm79_vm1 = vcmask 130048  }
  0x27   :  { %115 = vmatprep.mubr.bf16.mxu1 %v476_v0  ;;  %336 = vmatprep.subr.bf16.mxu0 %v477_v1  ;;  %v367_v2 = vld [vmem:[#allocation5 + $0x4] ss:$12 sps:$4 sm:$0xff]   ;;  %v369_v3 = vld [vmem:[#allocation5] ss:$12 sps:$4 sm:$0xff]   ;;  %v58_v4 = vld [vmem:[#allocation2] sm:$0xf] }
  0x28   :  { %352 = vmatprep.mubr.msk.bf16.mxu0 %vm478_vm0, %v477_v1  ;;  %97 = vmatprep.subr.bf16.mxu1 %v367_v2  ;;  %v370_v5 = vld [vmem:[#allocation5 + $0x8] ss:$12 sps:$4 sm:$0xff]   ;;  %v373_v8 = vld [vmem:[#allocation7 + $0x28] sm:$0xff]   ;;  %v374_v9 = vld [vmem:[#allocation7 + $0x20] sm:$0xff]   ;;  %s479_s7 = smov [#allocation8]   ;;  %vm287_vm2 = vcmask 64512  }
  0x29   :  { %98 = vmatpush1.bf16.msra.mxu1 %v369_v3  ;;  %v371_v6 = vld [vmem:[#allocation7 + $0x38] sm:$0xff]   ;;  %v372_v7 = vld [vmem:[#allocation7 + $0x30] sm:$0xff]   ;;  %v377_v12 = vld [vmem:[#allocation7 + $0x8] sm:$0xff]   ;;  %s295_s8 = sshll.u32 %s479_s7, 4  ;;  %s296_s8 = int_to_ptr.vmem [resolvable:$true] %s295_s8 }
  0x2a   :  { %330 = vmatprep.subr.bf16.mxu1 %v477_v1  ;;  %337 = vmatpush3.bf16.msra.mxu0 %v371_v6  ;;  %v375_v10 = vld [vmem:[#allocation7 + $0x18] sm:$0xff]   ;;  %v376_v11 = vld [vmem:[#allocation7 + $0x10] sm:$0xff]   ;;  %v378_v13 = vld [vmem:[#allocation7] sm:$0xff]   ;;  %p448_p2 = scmp.lt.s32.totalorder %s296_s8, %s296_s8 }
  0x2b   :  { %338 = vmatprep.subr.bf16.mxu0 %v477_v1  ;;  %v310_v25 = vld [vmem:[%s525_s3] ss:$0 sm:$0xff]  ;;  %s443_s3 = scalar_lea.vmem %s296_s8, 128 }
  0x2c   :  { %308 = vmatmul.mubr.msk.bf16.vlgmr.msra.gmra.mxu1 %vm79_vm1, %v58_v4  ;;  %p444_p1 = scmp.ne.s32.totalorder %s296_s8, %s443_s3  ;;  %p449_p3 = scmp.lt.s32.totalorder %s443_s3, %s443_s3 }
  0x2d   :  { %331 = vmatpush3.bf16.msra.mxu1 %v370_v5  ;;  %332 = vmatprep.mubr.msk.bf16.mxu1 %vm478_vm0, %v477_v1 }
  0x2e   :  { %339 = vmatpush3.bf16.msra.mxu0 %v372_v7  ;;  %p450_p4 = por %p449_p3, %p448_p2 }
  0x2f   :  { %340 = vmatprep.subr.bf16.mxu0 %v477_v1 }
  0x30   :  { %p451_p5 = pnand %p450_p4, %p444_p1 }
  0x32   :  { %341 = vmatpush3.bf16.msra.mxu0 %v373_v8 }
  0x33   :  { %342 = vmatprep.subr.bf16.mxu0 %v477_v1 }
  0x34   :  { %333 = vmatmul.mubr.msk.bf16.vlgmr.msra.gmra.mxu1 %vm79_vm1, %v58_v4 }
  0x36   :  { %343 = vmatpush3.bf16.msra.mxu0 %v374_v9 }
  0x37   :  { %344 = vmatprep.subr.bf16.mxu0 %v477_v1 }
  0x3a   :  { %345 = vmatpush3.bf16.msra.mxu0 %v375_v10 }
  0x3b   :  { %346 = vmatprep.subr.bf16.mxu0 %v477_v1 }
  0x3e   :  { %347 = vmatpush3.bf16.msra.mxu0 %v376_v11 }
  0x3f   :  { %348 = vmatprep.subr.bf16.mxu0 %v477_v1 }
  0x42   :  { %349 = vmatpush3.bf16.msra.mxu0 %v377_v12 }
  0x43   :  { %350 = vmatprep.subr.bf16.mxu0 %v477_v1 }
  0x46   :  { %351 = vmatpush3.bf16.msra.mxu0 %v378_v13 }
  0xec   :  { %v117_v14 = vpop.f32.mrf.mxu1 }
  0xee   :  { %v119_v15 = vpop.f32.mrf.mxu1 }
  0xef   :  { %v164_v18 = vmax.f32 %v117_v14, %v119_v15 }
  0xf0   :  { %v121_v16 = vpop.f32.mrf.mxu1 }
  0xf2   :  { %v122_v17 = vpop.f32.mrf.mxu1 }
  0xf4   :  { %v158_v19 = vpop.f32.mrf.mxu1 }
  0xf5   :  { %v165_v20 = vmax.f32 %v164_v18, %v158_v19 }
  0xf6   :  { %v334_v21 = vpop.f32.mrf.mxu1 }
  0xf7   :  { %v166_v22 = vpack.c.bf16 %v165_v20, %v165_v20 }
  0xf8   :  { %v161_v23 = vpop.f32.mrf.mxu1 }
  0xf9   :  { %353 = vmatmul.mubr.bf16.vlgmr.msra.gmra.mxu0 %v166_v22 }
  0xfa   :  { %v335_v24 = vpop.f32.mrf.mxu1 }
 0x1b9   :  { %v272_v26 = vpop.f32.mrf.mxu0 }
 0x1ba   :  { %v273_v27 = vadd.f32 %v310_v25, %v272_v26 }
 0x1bb   :  { %v354_v28 = vpop.f32.mrf.mxu0 }
 0x1bc   :  { %278 = vmax.xlane.f32.xlu0 %v273_v27 }
 0x1bd   :  { %v275_v29 = vpop.f32.mrf.mxu0 }
 0x1bf   :  { %v355_v30 = vpop.f32.mrf.mxu0 }
 0x245   :  { %v279_v31 = vpop.xlane.xlu0 %278 }
 0x246   :  { %v280_v32 = vsub.f32 %v273_v27, %v279_v31 }
 0x248   :  { %v281_v33 = vmul.f32 1.442695, %v280_v32 }
 0x24a   :  { %379 = vpow2.f32 %v281_v33 }
 0x257   :  { %v380_v34 = vpop.eup %379 }
 0x258   :  { %283 = vadd.xlane.f32.xlu0 %v380_v34 }
 0x2e1   :  { %v284_v35 = vpop.xlane.xlu0 %283 }
 0x2e2   :  { %381 = vrcp.f32 %v284_v35 }
 0x2ef   :  { %v382_v36 = vpop.eup %381 }
 0x2f0   :  { %v286_v37 = vmul.f32 %v382_v36, %v380_v34 }
 0x2f2   :  { %288 = vst.msk [vmem:[#allocation8] sm:$0xff] %vm287_vm2, %v286_v37 }
 0x2f3   :  { %454 = shalt.err (!%p451_p5)
}
 0x2f4   :  { %298 = dma.vmem_to_hbm [thread:$0]  %s296_s8, 128, %s526_s4, [#allocation4]  }
 0x2f5   :  { %467 = dma.done.wait [#allocation4], 128  }
 0x2f6   :  { %468 = vsyncadd [#allocation4], 4294967168 }
 0x2f7   :  { %302 = vsyncpa [#allocation3], 1 }
 0x2f8   :  { %303 = vsyncpa [#allocation6], 1 }
 0x2f9   :  { %304 = vsyncpa [#allocation4], 1 }

</bundles_post_ra>
